<compile_context>
chip_gen: v5e
topology: v5e:2x2
jax: 0.10.0
libtpu: 0.0.40
codegen_flags: <defaults>
</compile_context>

<pallas_src>
import functools
import math

import jax
import jax.numpy as jnp
from jax import lax
from jax.experimental import pallas as pl
from jax.experimental.pallas import tpu as pltpu

INPUT_DIM = 62
HIDDEN = (64, 32)
NEG_SLOPE = 0.01


def _cdiv(a, b):
    return -(-a // b)


def _round_up(a, m):
    return _cdiv(a, m) * m


def mlp_kernel(x_ref, w1_ref, b1_ref, w2_ref, b2_ref, w3_ref, b3_ref, o_ref):
    # x_ref: (TB, 62) f32 tile in its natural [batch, feature] layout.
    # Cast to bf16 in-kernel (VPU slots are otherwise idle here).
    x = x_ref[...].astype(jnp.bfloat16)

    # Layer 1: (64, 62) x (TB, 62)^T -> (64, TB), f32 MXU accumulation.
    # Contraction is on x's LAST dim, so the feature-major flip happens inside
    # the kernel instead of as an extra HBM pass in the wrapper.
    h1 = lax.dot_general(
        w1_ref[...], x, (((1,), (1,)), ((), ())),
        preferred_element_type=jnp.float32)
    # Bias add, then cast to bf16 *before* the activation so the (64, TB) f32
    # intermediate never round-trips through VMEM.
    h1 = (h1 + b1_ref[...]).astype(jnp.bfloat16)
    h1 = jnp.maximum(h1, NEG_SLOPE * h1)          # LeakyReLU (valid: slope < 1)
    # Dropout (eval mode) == identity.

    # Layer 2: (32, 64) @ (64, TB) -> (32, TB), f32 accumulation.
    h2 = jnp.dot(w2_ref[...], h1, preferred_element_type=jnp.float32) + b2_ref[...]
    h2 = jnp.maximum(h2, NEG_SLOPE * h2)
    # Dropout (eval mode) == identity.

    # Layer 3 (32 -> 1): VPU multiply + sublane reduce; the result is naturally
    # a lane-dense (1, TB) row (no masked width-1 stores).
    out = jnp.sum(h2 * w3_ref[...], axis=0, keepdims=True) + b3_ref[...]
    o_ref[...] = out.astype(o_ref.dtype)


@functools.partial(jax.jit, static_argnames=("tb",))
def custom_nn_forward(x, params, *, tb=8192):
    """x: [B, INPUT_DIM] float32 -> [B, 1] float32 (eval-mode forward)."""
    w1, b1, w2, b2, w3, b3 = params  # PyTorch layout: W is (out, in), b is (out,)
    B, F = x.shape

    # ---- B-aware batch-tile selection -------------------------------------
    #  * tile large enough to amortize the ~0.35us per-grid-step overhead,
    #  * even number of blocks (when >1) so the "parallel" axis shards across
    #    both TensorCores on v7x,
    #  * bounded padding waste (no power-of-two tile blow-up).
    B128 = _round_up(B, 128)
    n_blocks = _cdiv(B128, tb)
    if n_blocks > 1 and n_blocks % 2 == 1:
        n_blocks += 1
    if n_blocks == 1:
        TB = B                       # single block == full array (always legal)
    else:
        TB = _round_up(_cdiv(B128, n_blocks), 128)
    grid = _cdiv(B, TB)
    # If the last block is partial, OOB input rows are unspecified and the
    # corresponding OOB output columns are dropped; rows are independent, so
    # this is safe and avoids any wrapper-side padding copy of x.

    # Tiny weight/bias prep (negligible bytes; fuses under jit).
    w1b = w1.astype(jnp.bfloat16)                  # (64, 62)
    w2b = w2.astype(jnp.bfloat16)                  # (32, 64)
    b1c = b1.reshape(-1, 1).astype(jnp.float32)    # (64, 1)
    b2c = b2.reshape(-1, 1).astype(jnp.float32)    # (32, 1)
    w3c = w3.reshape(-1, 1).astype(jnp.float32)    # (32, 1)
    b3c = b3.reshape(1, 1).astype(jnp.float32)     # (1, 1)

    resident = lambda shape: pl.BlockSpec(shape, lambda i: (0, 0))

    # Per-step VMEM ~= 2.1 KiB * TB (double-buffered lane-padded f32 x tile +
    # bf16 copy + h1/h2 intermediates).  Raise the scoped limit above v5e's
    # 16 MiB default; stay well below v7x's 64 MiB physical VMEM.
    vmem_limit = int(min(48 << 20, max(32 << 20, 3 * 1024 * TB + (4 << 20))))

    flops = 2 * grid * TB * (INPUT_DIM * HIDDEN[0] + HIDDEN[0] * HIDDEN[1] + HIDDEN[1])
    bytes_accessed = (
        B * INPUT_DIM * 4 + B * 4                                # x f32 in, out f32
        + (INPUT_DIM * HIDDEN[0] + HIDDEN[0] * HIDDEN[1]) * 2    # bf16 weights
        + (HIDDEN[0] + 2 * HIDDEN[1] + 1) * 4                    # f32 biases + w3
    )

    out = pl.pallas_call(
        mlp_kernel,
        out_shape=jax.ShapeDtypeStruct((1, B), jnp.float32),
        grid=(grid,),
        in_specs=[
            pl.BlockSpec((TB, F), lambda i: (i, 0)),   # x streams, natural layout
            resident(w1b.shape), resident(b1c.shape),  # params stay VMEM-resident
            resident(w2b.shape), resident(b2c.shape),
            resident(w3c.shape), resident(b3c.shape),
        ],
        out_specs=pl.BlockSpec((1, TB), lambda i: (0, i)),   # lane-dense output
        compiler_params=pltpu.CompilerParams(
            dimension_semantics=("parallel",),
            vmem_limit_bytes=vmem_limit),
        cost_estimate=pl.CostEstimate(
            flops=flops, transcendentals=0, bytes_accessed=bytes_accessed),
    )(x, w1b, b1c, w2b, b2c, w3c, b3c)

    # (1, B) lane-dense row -> (B, 1) column (same flat order).
    return out.reshape(B, 1)


def init_params(key):
    """kaiming_normal_(mode='fan_in', nonlinearity='leaky_relu'), zero biases.

    Weights stored in PyTorch layout: (fan_out, fan_in)."""
    dims = (INPUT_DIM,) + HIDDEN + (1,)
    gain = math.sqrt(2.0)  # PyTorch default a=0 for kaiming_normal_
    params = []
    for i in range(len(dims) - 1):
        fan_in, fan_out = dims[i], dims[i + 1]
        key, sub = jax.random.split(key)
        std = gain / math.sqrt(fan_in)
        w = std * jax.random.normal(sub, (fan_out, fan_in), dtype=jnp.float32)
        b = jnp.zeros((fan_out,), dtype=jnp.float32)
        params += [w, b]
    return tuple(params)


def reference_forward(x, params):
    """Pure-JAX reference mirroring the kernel's bf16 rounding of x/W1/W2/h1."""
    w1, b1, w2, b2, w3, b3 = params
    bf = lambda a: a.astype(jnp.bfloat16).astype(jnp.float32)
    h1 = bf(x) @ bf(w1).T + b1
    h1 = bf(h1)
    h1 = jnp.maximum(h1, NEG_SLOPE * h1)
    h2 = h1 @ bf(w2).T + b2
    h2 = jnp.maximum(h2, NEG_SLOPE * h2)
    return h2 @ w3.T + b3


if __name__ == "__main__":
    key = jax.random.PRNGKey(0)
    pkey, xkey = jax.random.split(key)
    params = init_params(pkey)

    B = 256
    x = jax.random.normal(xkey, (B, INPUT_DIM), dtype=jnp.float32)

    out = jax.block_until_ready(custom_nn_forward(x, params))
    ref = reference_forward(x, params)

    assert out.shape == (B, 1), out.shape
    assert jnp.allclose(out, ref, atol=2e-2, rtol=2e-2), float(
        jnp.max(jnp.abs(out - ref)))

    # Also exercise the multi-block (grid > 1, both-TC-shardable) path.
    out2 = jax.block_until_ready(custom_nn_forward(x, params, tb=128))
    assert jnp.allclose(out2, ref, atol=2e-2, rtol=2e-2), float(
        jnp.max(jnp.abs(out2 - ref)))

    print("KERNEL_OK")
</pallas_src>

<mosaic_0001>
module attributes {stable_mosaic.version = 11 : i64} {
  func.func @mlp_kernel(%arg0: i32, %arg1: memref<256x62xf32, #tpu.memory_space<vmem>>, %arg2: memref<64x62xbf16, #tpu.memory_space<vmem>>, %arg3: memref<64x1xf32, #tpu.memory_space<vmem>>, %arg4: memref<32x64xbf16, #tpu.memory_space<vmem>>, %arg5: memref<32x1xf32, #tpu.memory_space<vmem>>, %arg6: memref<32x1xf32, #tpu.memory_space<vmem>>, %arg7: memref<1x1xf32, #tpu.memory_space<vmem>>, %arg8: memref<1x256xf32, #tpu.memory_space<vmem>>) attributes {dimension_semantics = [#tpu.dimension_semantics<parallel>], iteration_bounds = array<i64: 1>, scalar_prefetch = 0 : i64, scratch_operands = 0 : i64, tpu.core_type = #tpu.core_type<tc>, window_params = [{transform_indices = @transform_0, window_bounds = array<i64: 256, 62>}, {pipeline_mode = #tpu.pipeline_mode<synchronous>, transform_indices = @transform_1, window_bounds = array<i64: 64, 62>}, {pipeline_mode = #tpu.pipeline_mode<synchronous>, transform_indices = @transform_2, window_bounds = array<i64: 64, 1>}, {pipeline_mode = #tpu.pipeline_mode<synchronous>, transform_indices = @transform_3, window_bounds = array<i64: 32, 64>}, {pipeline_mode = #tpu.pipeline_mode<synchronous>, transform_indices = @transform_4, window_bounds = array<i64: 32, 1>}, {pipeline_mode = #tpu.pipeline_mode<synchronous>, transform_indices = @transform_5, window_bounds = array<i64: 32, 1>}, {pipeline_mode = #tpu.pipeline_mode<synchronous>, transform_indices = @transform_6, window_bounds = array<i64: 1, 1>}, {transform_indices = @transform_7, window_bounds = array<i64: 1, 256>}]} {
    %c0 = arith.constant 0 : index
    %c0_0 = arith.constant 0 : index
    %0 = vector.load %arg1[%c0, %c0_0] : memref<256x62xf32, #tpu.memory_space<vmem>>, vector<256x62xf32>
    %1 = arith.truncf %0 : vector<256x62xf32> to vector<256x62xbf16>
    %c0_1 = arith.constant 0 : index
    %c0_2 = arith.constant 0 : index
    %2 = vector.load %arg2[%c0_1, %c0_2] : memref<64x62xbf16, #tpu.memory_space<vmem>>, vector<64x62xbf16>
    %cst = arith.constant dense<0.000000e+00> : vector<64x256xf32>
    %3 = tpu.matmul %2, %1, %cst {dimension_numbers = #tpu.dot_dimension_numbers<[1], [1], [0], [0], [0, 0, 1, 0], [], []>} : vector<64x62xbf16>, vector<256x62xbf16>, vector<64x256xf32> -> vector<64x256xf32>
    %c0_3 = arith.constant 0 : index
    %c0_4 = arith.constant 0 : index
    %4 = vector.load %arg3[%c0_3, %c0_4] : memref<64x1xf32, #tpu.memory_space<vmem>>, vector<64x1xf32>
    %5 = vector.broadcast %4 : vector<64x1xf32> to vector<64x256xf32>
    %6 = arith.addf %3, %5 : vector<64x256xf32>
    %7 = arith.truncf %6 : vector<64x256xf32> to vector<64x256xbf16>
    %cst_5 = arith.constant 1.000980e-02 : bf16
    %8 = vector.broadcast %cst_5 : bf16 to vector<64x256xbf16>
    %9 = arith.mulf %8, %7 : vector<64x256xbf16>
    %10 = arith.maximumf %7, %9 : vector<64x256xbf16>
    %c0_6 = arith.constant 0 : index
    %c0_7 = arith.constant 0 : index
    %11 = vector.load %arg4[%c0_6, %c0_7] : memref<32x64xbf16, #tpu.memory_space<vmem>>, vector<32x64xbf16>
    %cst_8 = arith.constant dense<0.000000e+00> : vector<32x256xf32>
    %12 = tpu.matmul %11, %10, %cst_8 {dimension_numbers = #tpu.dot_dimension_numbers<[1], [0], [0], [1], [0, 0, 1, 1], [], []>} : vector<32x64xbf16>, vector<64x256xbf16>, vector<32x256xf32> -> vector<32x256xf32>
    %c0_9 = arith.constant 0 : index
    %c0_10 = arith.constant 0 : index
    %13 = vector.load %arg5[%c0_9, %c0_10] : memref<32x1xf32, #tpu.memory_space<vmem>>, vector<32x1xf32>
    %14 = vector.broadcast %13 : vector<32x1xf32> to vector<32x256xf32>
    %15 = arith.addf %12, %14 : vector<32x256xf32>
    %cst_11 = arith.constant 0.00999999977 : f32
    %16 = vector.broadcast %cst_11 : f32 to vector<32x256xf32>
    %17 = arith.mulf %16, %15 : vector<32x256xf32>
    %18 = arith.maximumf %15, %17 : vector<32x256xf32>
    %c0_12 = arith.constant 0 : index
    %c0_13 = arith.constant 0 : index
    %19 = vector.load %arg6[%c0_12, %c0_13] : memref<32x1xf32, #tpu.memory_space<vmem>>, vector<32x1xf32>
    %20 = vector.broadcast %19 : vector<32x1xf32> to vector<32x256xf32>
    %21 = arith.mulf %18, %20 : vector<32x256xf32>
    %cst_14 = arith.constant dense<0.000000e+00> : vector<256xf32>
    %22 = vector.multi_reduction <add>, %21, %cst_14 [0] : vector<32x256xf32> to vector<256xf32>
    %23 = vector.shape_cast %22 : vector<256xf32> to vector<1x256xf32>
    %c0_15 = arith.constant 0 : index
    %c0_16 = arith.constant 0 : index
    %24 = vector.load %arg7[%c0_15, %c0_16] : memref<1x1xf32, #tpu.memory_space<vmem>>, vector<1x1xf32>
    %25 = vector.broadcast %24 : vector<1x1xf32> to vector<1x256xf32>
    %26 = arith.addf %23, %25 : vector<1x256xf32>
    %c0_17 = arith.constant 0 : index
    %c0_18 = arith.constant 0 : index
    %27 = vector.load %arg8[%c0_17, %c0_18] : memref<1x256xf32, #tpu.memory_space<vmem>>, vector<1x256xf32>
    tpu.vector_store %arg8[%c0_17, %c0_18], %26 {strides = array<i32>} : memref<1x256xf32, #tpu.memory_space<vmem>>, vector<1x256xf32>,
    return
  }
  func.func @transform_0(%arg0: i32) -> (i32, i32) {
    %c0_i32 = arith.constant 0 : i32
    %c0_i32_0 = arith.constant 0 : i32
    return %arg0, %c0_i32 : i32, i32
  }
  func.func @transform_1(%arg0: i32) -> (i32, i32) {
    %c0_i32 = arith.constant 0 : i32
    %c0_i32_0 = arith.constant 0 : i32
    %c0_i32_1 = arith.constant 0 : i32
    return %c0_i32, %c0_i32_0 : i32, i32
  }
  func.func @transform_2(%arg0: i32) -> (i32, i32) {
    %c0_i32 = arith.constant 0 : i32
    %c0_i32_0 = arith.constant 0 : i32
    %c0_i32_1 = arith.constant 0 : i32
    return %c0_i32, %c0_i32_0 : i32, i32
  }
  func.func @transform_3(%arg0: i32) -> (i32, i32) {
    %c0_i32 = arith.constant 0 : i32
    %c0_i32_0 = arith.constant 0 : i32
    %c0_i32_1 = arith.constant 0 : i32
    return %c0_i32, %c0_i32_0 : i32, i32
  }
  func.func @transform_4(%arg0: i32) -> (i32, i32) {
    %c0_i32 = arith.constant 0 : i32
    %c0_i32_0 = arith.constant 0 : i32
    %c0_i32_1 = arith.constant 0 : i32
    return %c0_i32, %c0_i32_0 : i32, i32
  }
  func.func @transform_5(%arg0: i32) -> (i32, i32) {
    %c0_i32 = arith.constant 0 : i32
    %c0_i32_0 = arith.constant 0 : i32
    %c0_i32_1 = arith.constant 0 : i32
    return %c0_i32, %c0_i32_0 : i32, i32
  }
  func.func @transform_6(%arg0: i32) -> (i32, i32) {
    %c0_i32 = arith.constant 0 : i32
    %c0_i32_0 = arith.constant 0 : i32
    %c0_i32_1 = arith.constant 0 : i32
    return %c0_i32, %c0_i32_0 : i32, i32
  }
  func.func @transform_7(%arg0: i32) -> (i32, i32) {
    %c0_i32 = arith.constant 0 : i32
    %c0_i32_0 = arith.constant 0 : i32
    return %c0_i32, %arg0 : i32, i32
  }
}

</mosaic_0001>

<bundles_post_ra>
// kernel: custom_nn_forward.1
= control target key start
LH: loop header
LB: loop body
LE: loop exit
PB: predicated region body
PF: predicated region fallthrough
CT: control target
= control target key end

     0   :  { %s869_s0 = inlined_call_operand.vmem [shape: f32[256,62], index: 0, kind: input, shape index: {}]   ;;  %s870_s1 = inlined_call_operand.vmem [shape: bf16[64,62], index: 1, kind: input, shape index: {}]   ;;  %s871_s2 = inlined_call_operand.vmem [shape: f32[64,1], index: 2, kind: input, shape index: {}]   ;;  %s872_s3 = inlined_call_operand.vmem [shape: bf16[32,64], index: 3, kind: input, shape index: {}]   ;;  %s873_s4 = inlined_call_operand.vmem [shape: f32[32,1], index: 4, kind: input, shape index: {}]   ;;  %s874_s5 = inlined_call_operand.vmem [shape: f32[32,1], index: 5, kind: input, shape index: {}]   ;;  %s875_s6 = inlined_call_operand.<no memory space> [shape: f32[1,1], index: 6, kind: input, shape index: {}]   ;;  %s876_s7 = inlined_call_operand.hbm [shape: f32[1,256], index: 7, kind: output, shape index: {}]  }
   0x1   :  { %v12_v0 = vstv %s875_s6 }
   0x2   :  { %13 = vst [vmem:[#allocation2] sm:$0x1] %v12_v0 }
   0x3   :  { %v44_v1 = vld [vmem:[%s869_s0 + $0x70] sm:$0xff]  ;;  %v45_v2 = vld [vmem:[%s869_s0 + $0x78] sm:$0xff]  ;;  %vm154_vm0 = vcmask 506880   ;;  %v42_v7 = vld [vmem:[%s869_s0 + $0x60] sm:$0xff] }
   0x4   :  { %v60_v3 = vld [vmem:[%s869_s0 + $0xf0] sm:$0xff]  ;;  %v69_v4 = vpack.c.bf16 %v45_v2, %v44_v1  ;;  %v61_v5 = vld [vmem:[%s869_s0 + $0xf8] sm:$0xff]  ;;  %v43_v8 = vld [vmem:[%s869_s0 + $0x68] sm:$0xff] }
   0x5   :  { %v77_v6 = vpack.c.bf16 %v61_v5, %v60_v3  ;;  %v58_v10 = vld [vmem:[%s869_s0 + $0xe0] sm:$0xff]  ;;  %v59_v11 = vld [vmem:[%s869_s0 + $0xe8] sm:$0xff]  ;;  %v68_v13 = vpack.c.bf16 %v43_v8, %v42_v7 }
   0x6   :  { %v189_v9 = vsel %vm154_vm0, %v69_v4, 0  ;;  %v76_v14 = vpack.c.bf16 %v59_v11, %v58_v10 }
   0x7   :  { %215 = vmatpush.bf16.xpose.msra.mxu0 %v189_v9  ;;  %v213_v12 = vsel %vm154_vm0, %v77_v6, 0  ;;  %588 = vmatpush.bf16.xpose.msra.mxu2 %v189_v9 }
   0x8   :  { %244 = vmatpush.bf16.xpose.msra.mxu1 %v213_v12  ;;  %596 = vmatpush.bf16.xpose.msra.mxu3 %v213_v12 }
   0x9   :  { %14 = vsyncpa [#allocation4], 0  ;;  %v186_v15 = vsel %vm154_vm0, %v68_v13, 0  ;;  %v210_v16 = vsel %vm154_vm0, %v76_v14, 0  ;;  %v40_v17 = vld [vmem:[%s869_s0 + $0x50] sm:$0xff]  ;;  %v41_v18 = vld [vmem:[%s869_s0 + $0x58] sm:$0xff] }
   0xa   :  { %v56_v19 = vld [vmem:[%s869_s0 + $0xd0] sm:$0xff]  ;;  %v57_v20 = vld [vmem:[%s869_s0 + $0xd8] sm:$0xff]  ;;  %v67_v21 = vpack.c.bf16 %v41_v18, %v40_v17  ;;  %v38_v25 = vld [vmem:[%s869_s0 + $0x40] sm:$0xff]  ;;  %v635_v40 = vmov 0   ;;  %vm399_vm1 = vcmask 523264   ;;  %s537_s11 = sshll.u32 %s876_s7, 4  ;;  %s538_s11 = int_to_ptr.hbm [resolvable:$true] %s537_s11 }
   0xb   :  { %v75_v22 = vpack.c.bf16 %v57_v20, %v56_v19  ;;  %v39_v26 = vld [vmem:[%s869_s0 + $0x48] sm:$0xff]  ;;  %v54_v27 = vld [vmem:[%s869_s0 + $0xc0] sm:$0xff]  ;;  %v36_v33 = vld [vmem:[%s869_s0 + $0x30] sm:$0xff]  ;;  %606 = vset.pattern.permute.xlu0 %v635_v40  ;;  %607 = vset.pattern.permute.xlu1 %v635_v40  ;;  %vm522_vm2 = vcmask 1040384  }
   0xc   :  { %v183_v23 = vsel %vm154_vm0, %v67_v21, 0  ;;  %v55_v28 = vld [vmem:[%s869_s0 + $0xc8] sm:$0xff]  ;;  %v66_v29 = vpack.c.bf16 %v39_v26, %v38_v25  ;;  %v37_v34 = vld [vmem:[%s869_s0 + $0x38] sm:$0xff]  ;;  %v52_v35 = vld [vmem:[%s869_s0 + $0xb0] sm:$0xff]  ;;  %608 = vset.pattern.permute.xlu2 %v635_v40 }
   0xd   :  { %v207_v24 = vsel %vm154_vm0, %v75_v22, 0  ;;  %v74_v30 = vpack.c.bf16 %v55_v28, %v54_v27  ;;  %v53_v36 = vld [vmem:[%s869_s0 + $0xb8] sm:$0xff]  ;;  %v65_v37 = vpack.c.bf16 %v37_v34, %v36_v33  ;;  %v92_v38 = vld [vmem:[%s871_s2 + $0x30] sm:$0xff]  ;;  %v34_v43 = vld [vmem:[%s869_s0 + $0x20] sm:$0xff] }
   0xe   :  { %v180_v31 = vsel %vm154_vm0, %v66_v29, 0  ;;  %v73_v39 = vpack.c.bf16 %v53_v36, %v52_v35  ;;  %126 = vperm.xlu0 %606, %v92_v38   ;;  %v35_v44 = vld [vmem:[%s869_s0 + $0x28] sm:$0xff]  ;;  %v50_v45 = vld [vmem:[%s869_s0 + $0xa0] sm:$0xff]  ;;  %v93_v47 = vld [vmem:[%s871_s2 + $0x38] sm:$0xff] }
   0xf   :  { %216 = vmatpush.bf16.xpose.msra.mxu0 %v186_v15  ;;  %589 = vmatpush.bf16.xpose.msra.mxu2 %v186_v15  ;;  %v204_v32 = vsel %vm154_vm0, %v74_v30, 0  ;;  %v177_v41 = vsel %vm154_vm0, %v65_v37, 0  ;;  %v51_v46 = vld [vmem:[%s869_s0 + $0xa8] sm:$0xff]  ;;  %v90_v48 = vld [vmem:[%s871_s2 + $0x20] sm:$0xff]  ;;  %v64_v49 = vpack.c.bf16 %v35_v44, %v34_v43  ;;  %v32_v53 = vld [vmem:[%s869_s0 + $0x10] sm:$0xff] }
  0x10   :  { %245 = vmatpush.bf16.xpose.msra.mxu1 %v210_v16  ;;  %597 = vmatpush.bf16.xpose.msra.mxu3 %v210_v16  ;;  %v201_v42 = vsel %vm154_vm0, %v73_v39, 0  ;;  %v72_v50 = vpack.c.bf16 %v51_v46, %v50_v45  ;;  %v33_v54 = vld [vmem:[%s869_s0 + $0x18] sm:$0xff]  ;;  %v48_v55 = vld [vmem:[%s869_s0 + $0x90] sm:$0xff]  ;;  %v91_v57 = vld [vmem:[%s871_s2 + $0x28] sm:$0xff] }
  0x11   :  { %116 = vperm.xlu1 %607, %v90_v48   ;;  %v174_v51 = vsel %vm154_vm0, %v64_v49, 0  ;;  %v49_v56 = vld [vmem:[%s869_s0 + $0x98] sm:$0xff]  ;;  %v86_v58 = vld [vmem:[%s871_s2] sm:$0xff]  ;;  %v63_v59 = vpack.c.bf16 %v33_v54, %v32_v53  ;;  %v31_v0 = vld [vmem:[%s869_s0 + $0x8] sm:$0xff] }
  0x12   :  { %v198_v52 = vsel %vm154_vm0, %v72_v50, 0  ;;  %v71_v60 = vpack.c.bf16 %v49_v56, %v48_v55  ;;  %v30_v63 = vld [vmem:[%s869_s0] sm:$0xff]  ;;  %v47_v2 = vld [vmem:[%s869_s0 + $0x88] sm:$0xff]  ;;  %v367_v9 = vld [vmem:[%s873_s4 + $0x10] sm:$0xff] }
  0x13   :  { %v171_v61 = vsel %vm154_vm0, %v63_v59, 0  ;;  %v46_v1 = vld [vmem:[%s869_s0 + $0x80] sm:$0xff]  ;;  %v87_v3 = vld [vmem:[%s871_s2 + $0x8] sm:$0xff]  ;;  %v62_v5 = vpack.c.bf16 %v31_v0, %v30_v63  ;;  %v585_v12 = vld [vmem:[%s870_s1 + $0x18] sm:$0xff] }
  0x14   :  { %v195_v62 = vsel %vm154_vm0, %v71_v60, 0  ;;  %v366_v4 = vld [vmem:[%s873_s4 + $0x8] sm:$0xff]  ;;  %v70_v6 = vpack.c.bf16 %v47_v2, %v46_v1  ;;  %v460_v10 = vld [vmem:[%s874_s5] sm:$0xff]  ;;  %v88_v14 = vld [vmem:[%s871_s2 + $0x10] sm:$0xff] }
  0x15   :  { %v168_v7 = vsel %vm154_vm0, %v62_v5, 0  ;;  %v582_v11 = vld [vmem:[%s870_s1] sm:$0xff]  ;;  %v461_v13 = vld [vmem:[%s874_s5 + $0x8] sm:$0xff]  ;;  %v463_v15 = vld [vmem:[%s874_s5 + $0x18] sm:$0xff]  ;;  %106 = vperm.xlu2 %608, %v88_v14  }
  0x16   :  { %131 = vperm.xlu0 %606, %v93_v47   ;;  %v192_v8 = vsel %vm154_vm0, %v70_v6, 0  ;;  %v89_v16 = vld [vmem:[%s871_s2 + $0x18] sm:$0xff]  ;;  %v510_v17 = vld [vmem:[#allocation2] sm:$0x1]  ;;  %v583_v18 = vld [vmem:[%s870_s1 + $0x8] sm:$0xff] }
  0x17   :  { %217 = vmatpush.bf16.xpose.msra.mxu0 %v183_v23  ;;  %590 = vmatpush.bf16.xpose.msra.mxu2 %v183_v23  ;;  %v365_v19 = vld [vmem:[%s873_s4] sm:$0xff]  ;;  %v368_v20 = vld [vmem:[%s873_s4 + $0x18] sm:$0xff]  ;;  %v584_v21 = vld [vmem:[%s870_s1 + $0x10] sm:$0xff] }
  0x18   :  { %246 = vmatpush.bf16.xpose.msra.mxu1 %v207_v24  ;;  %598 = vmatpush.bf16.xpose.msra.mxu3 %v207_v24  ;;  %v462_v22 = vld [vmem:[%s874_s5 + $0x10] sm:$0xff] }
  0x19   :  { %121 = vperm.xlu1 %607, %v91_v57  }
  0x1d   :  { %111 = vperm.xlu2 %608, %v89_v16  }
  0x1e   :  { %96 = vperm.xlu0 %606, %v86_v58  }
  0x1f   :  { %218 = vmatpush.bf16.xpose.msra.mxu0 %v180_v31  ;;  %591 = vmatpush.bf16.xpose.msra.mxu2 %v180_v31 }
  0x20   :  { %247 = vmatpush.bf16.xpose.msra.mxu1 %v204_v32  ;;  %599 = vmatpush.bf16.xpose.msra.mxu3 %v204_v32 }
  0x21   :  { %101 = vperm.xlu1 %607, %v87_v3  }
  0x25   :  { %371 = vperm.xlu2 %608, %v365_v19  }
  0x26   :  { %376 = vperm.xlu0 %606, %v366_v4  }
  0x27   :  { %219 = vmatpush.bf16.xpose.msra.mxu0 %v177_v41  ;;  %592 = vmatpush.bf16.xpose.msra.mxu2 %v177_v41 }
  0x28   :  { %248 = vmatpush.bf16.xpose.msra.mxu1 %v201_v42  ;;  %600 = vmatpush.bf16.xpose.msra.mxu3 %v201_v42 }
  0x29   :  { %381 = vperm.xlu1 %607, %v367_v9  }
  0x2d   :  { %386 = vperm.xlu2 %608, %v368_v20  }
  0x2e   :  { %466 = vperm.xlu0 %606, %v460_v10  }
  0x2f   :  { %220 = vmatpush.bf16.xpose.msra.mxu0 %v174_v51  ;;  %593 = vmatpush.bf16.xpose.msra.mxu2 %v174_v51 }
  0x30   :  { %249 = vmatpush.bf16.xpose.msra.mxu1 %v198_v52  ;;  %601 = vmatpush.bf16.xpose.msra.mxu3 %v198_v52 }
  0x31   :  { %471 = vperm.xlu1 %607, %v461_v13  }
  0x35   :  { %476 = vperm.xlu2 %608, %v462_v22  }
  0x36   :  { %481 = vperm.xlu0 %606, %v463_v15  }
  0x37   :  { %221 = vmatpush.bf16.xpose.msra.mxu0 %v171_v61  ;;  %594 = vmatpush.bf16.xpose.msra.mxu2 %v171_v61 }
  0x38   :  { %250 = vmatpush.bf16.xpose.msra.mxu1 %v195_v62  ;;  %602 = vmatpush.bf16.xpose.msra.mxu3 %v195_v62 }
  0x39   :  { %513 = vperm.xlu1 %607, %v510_v17  }
  0x3f   :  { %222 = vmatpush.bf16.xpose.msra.mxu0 %v168_v7  ;;  %595 = vmatpush.bf16.xpose.msra.mxu2 %v168_v7 }
  0x40   :  { %251 = vmatpush.bf16.xpose.msra.mxu1 %v192_v8  ;;  %603 = vmatpush.bf16.xpose.msra.mxu3 %v192_v8 }
  0x46   :  { %562 = vmatmul.msk.bf16.vlgmr.msra.gmra.mxu0 %vm154_vm0, %v582_v11  ;;  %565 = vmatmul.msk.bf16.vlgmr.msra.gmra.mxu2 %vm154_vm0, %v585_v12 }
  0x47   :  { %566 = vmatmul.msk.bf16.vlgmr.msra.gmra.mxu1 %vm154_vm0, %v582_v11  ;;  %569 = vmatmul.msk.bf16.vlgmr.msra.gmra.mxu3 %vm154_vm0, %v585_v12 }
  0x56   :  { %563 = vmatmul.msk.bf16.gmra.mxu0 %vm154_vm0, %v583_v18 }
  0x57   :  { %567 = vmatmul.msk.bf16.gmra.mxu1 %vm154_vm0, %v583_v18 }
  0x66   :  { %564 = vmatmul.msk.bf16.gmra.mxu0 %vm154_vm0, %v584_v21 }
  0x67   :  { %568 = vmatmul.msk.bf16.gmra.mxu1 %vm154_vm0, %v584_v21 }
  0x6f   :  { %v107_v55 = vpop.permute.xlu2 %106 }
  0x77   :  { %v112_v0 = vpop.permute.xlu2 %111 }
  0x80   :  { %v127_v25 = vpop.permute.xlu0 %126 }
  0x83   :  { %v117_v39 = vpop.permute.xlu1 %116 }
  0x88   :  { %v132_v33 = vpop.permute.xlu0 %131 }
  0x8b   :  { %v122_v57 = vpop.permute.xlu1 %121 }
  0x90   :  { %v97_v6 = vpop.permute.xlu0 %96 }
  0x93   :  { %v102_v1 = vpop.permute.xlu1 %101 }
  0xc3   :  { %v224_v23 = vpop.f32.mrf.mxu0 }
  0xc4   :  { %v253_v24 = vpop.f32.mrf.mxu1  ;;  %v225_v12 = vadd.f32 %v224_v23, %v97_v6 }
  0xc5   :  { %v254_v13 = vadd.f32 %v253_v24, %v97_v6  ;;  %v377_v6 = vpop.permute.xlu0 %376 }
  0xc9   :  { %v239_v26 = vpop.f32.mrf.mxu2 }
  0xca   :  { %v240_v27 = vadd.f32 %v239_v26, %v127_v25  ;;  %v268_v28 = vpop.f32.mrf.mxu3  ;;  %v273_v26 = vpack.c.bf16 %v254_v13, %v225_v12 }
  0xcb   :  { %v226_v29 = vpop.f32.mrf.mxu0  ;;  %v269_v30 = vadd.f32 %v268_v28, %v127_v25 }
  0xcc   :  { %v255_v31 = vpop.f32.mrf.mxu1  ;;  %v227_v8 = vadd.f32 %v226_v29, %v102_v1 }
  0xcd   :  { %v279_v32 = vpack.c.bf16 %v269_v30, %v240_v27  ;;  %v256_v9 = vadd.f32 %v255_v31, %v102_v1 }
  0xcf   :  { %v293_v34 = vunpack.c.l.bf16 %v279_v32  ;;  %v294_v35 = vunpack.c.h.bf16 %v279_v32  ;;  %v274_v20 = vpack.c.bf16 %v256_v9, %v227_v8 }
  0xd1   :  { %v241_v36 = vpop.f32.mrf.mxu2  ;;  %v309_v44 = vmul.f32 0.010009766, %v293_v34  ;;  %v310_v45 = vmul.f32 0.010009766, %v294_v35  ;;  %v284_v23 = vunpack.c.h.bf16 %v274_v20 }
  0xd2   :  { %v242_v37 = vadd.f32 %v241_v36, %v132_v33  ;;  %v270_v38 = vpop.f32.mrf.mxu3 }
  0xd3   :  { %v229_v40 = vpop.f32.mrf.mxu0  ;;  %v271_v41 = vadd.f32 %v270_v38, %v132_v33  ;;  %v349_v49 = vmax.f32 %v293_v34, %v309_v44  ;;  %v350_v51 = vmax.f32 %v294_v35, %v310_v45  ;;  %v283_v33 = vunpack.c.l.bf16 %v274_v20 }
  0xd4   :  { %v258_v42 = vpop.f32.mrf.mxu1  ;;  %v230_v4 = vadd.f32 %v229_v40, %v107_v55  ;;  %v282_v38 = vunpack.c.h.bf16 %v273_v26 }
  0xd5   :  { %v280_v43 = vpack.c.bf16 %v271_v41, %v242_v37  ;;  %v259_v5 = vadd.f32 %v258_v42, %v107_v55  ;;  %v281_v37 = vunpack.c.l.bf16 %v273_v26  ;;  %v299_v45 = vmul.f32 0.010009766, %v283_v33 }
  0xd7   :  { %v295_v46 = vunpack.c.l.bf16 %v280_v43  ;;  %v296_v47 = vunpack.c.h.bf16 %v280_v43  ;;  %v275_v14 = vpack.c.bf16 %v259_v5, %v230_v4 }
  0xd9   :  { %v311_v48 = vmul.f32 0.010009766, %v295_v46  ;;  %v312_v50 = vmul.f32 0.010009766, %v296_v47  ;;  %v285_v27 = vunpack.c.l.bf16 %v275_v14  ;;  %v286_v28 = vunpack.c.h.bf16 %v275_v14 }
  0xdb   :  { %v231_v52 = vpop.f32.mrf.mxu0  ;;  %v351_v53 = vmax.f32 %v295_v46, %v311_v48  ;;  %v352_v54 = vmax.f32 %v296_v47, %v312_v50  ;;  %v302_v40 = vmul.f32 0.010009766, %v286_v28  ;;  %v300_v46 = vmul.f32 0.010009766, %v284_v23 }
  0xdc   :  { %v260_v56 = vpop.f32.mrf.mxu1  ;;  %v232_v2 = vadd.f32 %v231_v52, %v112_v0 }
  0xdd   :  { %v359_v58 = vpack.c.bf16 %v351_v53, %v349_v49  ;;  %v360_v59 = vpack.c.bf16 %v352_v54, %v350_v51  ;;  %v261_v3 = vadd.f32 %v260_v56, %v112_v0  ;;  %v342_v52 = vmax.f32 %v286_v28, %v302_v40  ;;  %v587_v0 = vld [vmem:[%s872_s3 + $0x8] sm:$0xff] }
  0xde   :  { %v297_v53 = vmul.f32 0.010009766, %v281_v37  ;;  %v298_v54 = vmul.f32 0.010009766, %v282_v38 }
  0xdf   :  { %410 = vmatpush.bf16.msrb.mxu2 %v359_v58  ;;  %429 = vmatpush.bf16.msrb.mxu3 %v360_v59  ;;  %v276_v10 = vpack.c.bf16 %v261_v3, %v232_v2  ;;  %v340_v58 = vmax.f32 %v284_v23, %v300_v46  ;;  %v372_v3 = vpop.permute.xlu2 %371 }
  0xe0   :  { %v337_v59 = vmax.f32 %v281_v37, %v297_v53 }
  0xe1   :  { %v287_v21 = vunpack.c.l.bf16 %v276_v10  ;;  %v288_v22 = vunpack.c.h.bf16 %v276_v10 }
  0xe3   :  { %v234_v60 = vpop.f32.mrf.mxu0  ;;  %v303_v35 = vmul.f32 0.010009766, %v287_v21  ;;  %v304_v36 = vmul.f32 0.010009766, %v288_v22 }
  0xe4   :  { %v263_v61 = vpop.f32.mrf.mxu1  ;;  %v235_v62 = vadd.f32 %v234_v60, %v117_v39  ;;  %v338_v60 = vmax.f32 %v282_v38, %v298_v54 }
  0xe5   :  { %v264_v63 = vadd.f32 %v263_v61, %v117_v39  ;;  %v301_v39 = vmul.f32 0.010009766, %v285_v27  ;;  %v343_v49 = vmax.f32 %v287_v21, %v303_v35  ;;  %v344_v50 = vmax.f32 %v288_v22, %v304_v36 }
  0xe7   :  { %v277_v7 = vpack.c.bf16 %v264_v63, %v235_v62  ;;  %v341_v51 = vmax.f32 %v285_v27, %v301_v39  ;;  %v356_v56 = vpack.c.bf16 %v344_v50, %v342_v52  ;;  %v354_v62 = vpack.c.bf16 %v340_v58, %v338_v60  ;;  %v586_v63 = vld [vmem:[%s872_s3] sm:$0xff]  ;;  %v387_v12 = vpop.permute.xlu2 %386  ;;  %s636_s3 = smov [#allocation3]  }
  0xe8   :  { %s535_s9 = sshll.u32 %s636_s3, 4  ;;  %s536_s9 = int_to_ptr.vmem [resolvable:$true] %s535_s9 }
  0xe9   :  { %v289_v17 = vunpack.c.l.bf16 %v277_v7  ;;  %v290_v18 = vunpack.c.h.bf16 %v277_v7  ;;  %v355_v55 = vpack.c.bf16 %v343_v49, %v341_v51  ;;  %v382_v7 = vpop.permute.xlu1 %381 }
  0xeb   :  { %v236_v11 = vpop.f32.mrf.mxu0  ;;  %v305_v31 = vmul.f32 0.010009766, %v289_v17  ;;  %v306_v32 = vmul.f32 0.010009766, %v290_v18 }
  0xec   :  { %v237_v15 = vadd.f32 %v236_v11, %v122_v57  ;;  %v265_v16 = vpop.f32.mrf.mxu1 }
  0xed   :  { %v266_v19 = vadd.f32 %v265_v16, %v122_v57  ;;  %v345_v41 = vmax.f32 %v289_v17, %v305_v31  ;;  %v346_v43 = vmax.f32 %v290_v18, %v306_v32  ;;  %v339_v57 = vmax.f32 %v283_v33, %v299_v45 }
  0xef   :  { %v278_v25 = vpack.c.bf16 %v266_v19, %v237_v15  ;;  %v353_v61 = vpack.c.bf16 %v339_v57, %v337_v59  ;;  %v477_v37 = vpop.permute.xlu2 %476 }
  0xf1   :  { %v291_v30 = vunpack.c.l.bf16 %v278_v25  ;;  %v292_v29 = vunpack.c.h.bf16 %v278_v25  ;;  %v467_v25 = vpop.permute.xlu0 %466 }
  0xf3   :  { %v307_v24 = vmul.f32 0.010009766, %v291_v30  ;;  %v308_v34 = vmul.f32 0.010009766, %v292_v29 }
  0xf5   :  { %v347_v42 = vmax.f32 %v291_v30, %v307_v24  ;;  %v348_v44 = vmax.f32 %v292_v29, %v308_v34  ;;  %v472_v29 = vpop.permute.xlu1 %471 }
  0xf7   :  { %v357_v47 = vpack.c.bf16 %v347_v42, %v345_v41  ;;  %v358_v48 = vpack.c.bf16 %v348_v44, %v346_v43 }
  0xf9   :  { %411 = vmatpush.bf16.msrb.mxu2 %v357_v47  ;;  %430 = vmatpush.bf16.msrb.mxu3 %v358_v48  ;;  %v482_v48 = vpop.permute.xlu0 %481 }
  0xfd   :  { %412 = vmatpush.bf16.msrb.mxu2 %v355_v55  ;;  %431 = vmatpush.bf16.msrb.mxu3 %v356_v56 }
 0x101   :  { %413 = vmatpush.bf16.msrb.mxu2 %v353_v61  ;;  %432 = vmatpush.bf16.msrb.mxu3 %v354_v62 }
 0x104   :  { %578 = vmatmul.msk.bf16.vlgmr.msrb.gmra.mxu2 %vm399_vm1, %v586_v63  ;;  %580 = vmatmul.msk.bf16.vlgmr.msrb.gmra.mxu3 %vm399_vm1, %v586_v63  ;;  %v514_v63 = vpop.permute.xlu1 %513 }
 0x114   :  { %579 = vmatmul.msk.bf16.gmra.mxu2 %vm399_vm1, %v587_v0  ;;  %581 = vmatmul.msk.bf16.gmra.mxu3 %vm399_vm1, %v587_v0 }
 0x187   :  { %v415_v1 = vpop.f32.mrf.mxu2  ;;  %v434_v2 = vpop.f32.mrf.mxu3 }
 0x188   :  { %v416_v10 = vadd.f32 %v415_v1, %v372_v3  ;;  %v435_v11 = vadd.f32 %v434_v2, %v372_v3  ;;  %v516_v2 = vperm.slane %v514_v63, 0 }
 0x18a   :  { %v444_v19 = vmul.f32 0.01, %v416_v10  ;;  %v445_v20 = vmul.f32 0.01, %v435_v11 }
 0x18c   :  { %v452_v28 = vmax.f32 %v416_v10, %v444_v19  ;;  %v453_v30 = vmax.f32 %v435_v11, %v445_v20 }
 0x18e   :  { %v484_v38 = vmul.f32 %v467_v25, %v452_v28  ;;  %v485_v39 = vmul.f32 %v467_v25, %v453_v30 }
 0x18f   :  { %v417_v4 = vpop.f32.mrf.mxu2  ;;  %v436_v5 = vpop.f32.mrf.mxu3 }
 0x190   :  { %v418_v8 = vadd.f32 %v417_v4, %v377_v6  ;;  %v437_v9 = vadd.f32 %v436_v5, %v377_v6  ;;  %v525_v5 = vlaneseq }
 0x192   :  { %v446_v15 = vmul.f32 0.01, %v418_v8  ;;  %v447_v16 = vmul.f32 0.01, %v437_v9  ;;  %vm527_vm3 = vcmp.lt.s32.totalorder %v525_v5, 256 }
 0x194   :  { %v454_v26 = vmax.f32 %v418_v8, %v446_v15  ;;  %v455_v27 = vmax.f32 %v437_v9, %v447_v16 }
 0x196   :  { %v486_v24 = vmul.f32 %v472_v29, %v454_v26  ;;  %v487_v34 = vmul.f32 %v472_v29, %v455_v27 }
 0x197   :  { %v420_v13 = vpop.f32.mrf.mxu2  ;;  %v439_v14 = vpop.f32.mrf.mxu3 }
 0x198   :  { %v421_v17 = vadd.f32 %v420_v13, %v382_v7  ;;  %v440_v18 = vadd.f32 %v439_v14, %v382_v7  ;;  %v492_v44 = vadd.f32 %v486_v24, %v484_v38  ;;  %v501_v45 = vadd.f32 %v487_v34, %v485_v39 }
 0x19a   :  { %v448_v21 = vmul.f32 0.01, %v421_v17  ;;  %v449_v22 = vmul.f32 0.01, %v440_v18 }
 0x19c   :  { %v456_v31 = vmax.f32 %v421_v17, %v448_v21  ;;  %v457_v32 = vmax.f32 %v440_v18, %v449_v22 }
 0x19e   :  { %v488_v40 = vmul.f32 %v477_v37, %v456_v31  ;;  %v489_v41 = vmul.f32 %v477_v37, %v457_v32 }
 0x19f   :  { %v422_v33 = vpop.f32.mrf.mxu2  ;;  %v441_v23 = vpop.f32.mrf.mxu3 }
 0x1a0   :  { %v423_v35 = vadd.f32 %v422_v33, %v387_v12  ;;  %v442_v36 = vadd.f32 %v441_v23, %v387_v12  ;;  %v493_v49 = vadd.f32 %v492_v44, %v488_v40  ;;  %v502_v50 = vadd.f32 %v501_v45, %v489_v41 }
 0x1a2   :  { %v450_v42 = vmul.f32 0.01, %v423_v35  ;;  %v451_v43 = vmul.f32 0.01, %v442_v36 }
 0x1a4   :  { %v458_v46 = vmax.f32 %v423_v35, %v450_v42  ;;  %v459_v47 = vmax.f32 %v442_v36, %v451_v43 }
 0x1a6   :  { %v490_v51 = vmul.f32 %v482_v48, %v458_v46  ;;  %v491_v52 = vmul.f32 %v482_v48, %v459_v47 }
 0x1a8   :  { %v494_v53 = vadd.f32 %v493_v49, %v490_v51  ;;  %v503_v54 = vadd.f32 %v502_v50, %v491_v52 }
 0x1aa   :  { %v495_v55 = vrot.slane %v494_v53, 4  ;;  %v504_v56 = vrot.slane %v503_v54, 4 }
 0x1ac   :  { %v496_v57 = vadd.f32 %v495_v55, %v494_v53  ;;  %v505_v58 = vadd.f32 %v504_v56, %v503_v54 }
 0x1ae   :  { %v497_v59 = vrot.slane %v496_v57, 2  ;;  %v506_v60 = vrot.slane %v505_v58, 2 }
 0x1b0   :  { %v498_v61 = vadd.f32 %v497_v59, %v496_v57  ;;  %v507_v62 = vadd.f32 %v506_v60, %v505_v58 }
 0x1b2   :  { %v499_v0 = vrot.slane %v498_v61, 1  ;;  %v508_v1 = vrot.slane %v507_v62, 1 }
 0x1b4   :  { %v500_v3 = vadd.f32 %v499_v0, %v498_v61  ;;  %v509_v4 = vadd.f32 %v508_v1, %v507_v62 }
 0x1b6   :  { %v518_v6 = vadd.f32 %v516_v2, %v509_v4  ;;  %v517_v7 = vadd.f32 %v516_v2, %v500_v3 }
 0x1b8   :  { %v521_v8 = vrot.slane %v518_v6, 7 }
 0x1ba   :  { %v523_v9 = vsel %vm522_vm2, %v517_v7, %v521_v8 }
 0x1bb   :  { %529 = vst.msk [vmem:[#allocation3] sm:$0x3] %vm527_vm3, %v523_v9 }
 0x1bc   :  { %540 = dma.vmem_to_hbm [thread:$0]  %s536_s9, 32, %s538_s11, [#allocation4]  }
 0x1bd   :  { %633 = dma.done.wait [#allocation4], 32  }
 0x1be   :  { %634 = vsyncadd [#allocation4], 4294967264 }
 0x1bf   :  { %545 = vsyncpa [#allocation4], 1 }

</bundles_post_ra>
